<compile_context>
chip_gen: v5e
topology: v5e:2x2
jax: 0.10.0
libtpu: 0.0.40
codegen_flags: <defaults>
</compile_context>

<pallas_src>
import functools
import math

import jax
import jax.numpy as jnp
from jax.experimental import pallas as pl
from jax.experimental.pallas import tpu as pltpu


def _rbf_kernel(*refs, low, step, inv_two_var, n_gauss, normalize, masked):
    """One row-tile of the Gaussian RBF expansion.

    refs: (d_ref[, m_ref], o_ref)
      d_ref : (TM, 1)  distances
      m_ref : (TM, 1)  optional distance mask
      o_ref : (TM, G)  expansion output (G = full array last dim, no padding)
    """
    if masked:
        d_ref, m_ref, o_ref = refs
    else:
        d_ref, o_ref = refs

    d = d_ref[...]                                              # (TM, 1)
    # Centers generated in-kernel: c_k = low + k * (high-low)/(G-1).
    k = jax.lax.broadcasted_iota(jnp.int32, (1, n_gauss), 1).astype(jnp.float32)
    c = low + step * k                                          # (1, G)
    diff = d - c                                                # (TM, G)
    g = jnp.exp(-inv_two_var * (diff * diff))                   # EUP exp

    if normalize and masked:
        denom = jnp.sum(g, axis=-1, keepdims=True)              # (TM, 1)
        # exact reciprocal (approx=True could miss the 1e-5 tolerance);
        # fold the mask into the same narrow column -> one wide multiply.
        scale = pl.reciprocal(denom, approx=False) * m_ref[...]
        g = g * scale
    elif normalize:
        denom = jnp.sum(g, axis=-1, keepdims=True)
        g = g * pl.reciprocal(denom, approx=False)
    elif masked:
        g = g * m_ref[...]

    o_ref[...] = g


def _num_tensorcores():
    """Best-effort TC-per-chip detection (perf policy only, never correctness)."""
    try:
        kind = jax.devices()[0].device_kind.lower()
        if "v7" in kind or "7x" in kind:
            return 2
    except Exception:
        pass
    return 1


class GaussianRBF:
    """JAX/Pallas port of cgnet GaussianRBF (forward pass)."""

    def __init__(self, low_cutoff=0.0, high_cutoff=5.0, n_gaussians=50,
                 variance=1.0, normalize_output=False):
        self.low_cutoff = float(low_cutoff)
        self.high_cutoff = float(high_cutoff)
        self.n_gaussians = int(n_gaussians)
        # deterministic "buffer", identical to torch.linspace
        self.centers = jnp.linspace(low_cutoff, high_cutoff, n_gaussians,
                                    dtype=jnp.float32)
        self.variance = float(variance)
        self.normalize_output = bool(normalize_output)

    def __len__(self):
        return self.n_gaussians

    def __call__(self, distances, distance_mask=None, *, block_m=2048):
        orig_shape = distances.shape                    # (E, B, N)
        G = self.n_gaussians
        M = math.prod(orig_shape)
        masked = distance_mask is not None

        d_flat = distances.reshape(M, 1).astype(jnp.float32)
        inputs = [d_flat]
        if masked:
            inputs.append(distance_mask.reshape(M, 1).astype(jnp.float32))
        ncols_in = len(inputs)

        # Row tile: largest tile that fits comfortably, rounded to the sublane
        # multiple of 8.  Ragged last block is fine (Pallas masks the OOB rows
        # on store; garbage in OOB input rows never touches valid rows).
        if M < 8:
            tm = M                                      # block == full first dim
        else:
            tm = max(8, (int(block_m) // 8) * 8)
            tm = min(tm, max(8, (M // 8) * 8))          # keep tm <= M (mult. of 8)
            # Only split for megacore on 2-TC chips (v7x); on single-TC
            # v5e/v6e the grid is a serial loop and splitting only adds
            # ~0.35 us per-step overhead.
            if _num_tensorcores() >= 2 and M > 8:
                tm = min(tm, ((pl.cdiv(M, 2) + 7) // 8) * 8)
        grid = (pl.cdiv(M, tm),)

        step = (self.high_cutoff - self.low_cutoff) / (G - 1) if G > 1 else 0.0
        kern = functools.partial(
            _rbf_kernel,
            low=self.low_cutoff,
            step=step,
            inv_two_var=0.5 / self.variance,
            n_gauss=G,
            normalize=self.normalize_output,
            masked=masked)

        row_spec = pl.BlockSpec((tm, 1), lambda i: (i, 0))
        in_specs = [row_spec] * ncols_in

        cost = pl.CostEstimate(
            flops=5 * M * G,
            transcendentals=M * G,
            bytes_accessed=4 * M * (ncols_in + G),
        )

        out = pl.pallas_call(
            kern,
            out_shape=jax.ShapeDtypeStruct((M, G), jnp.float32),
            grid_spec=pltpu.PrefetchScalarGridSpec(
                num_scalar_prefetch=0,
                grid=grid,
                in_specs=in_specs,
                # last dim == full array dim (G) -> legal block, no lane pad
                # in HBM, no post-kernel column slice.
                out_specs=pl.BlockSpec((tm, G), lambda i: (i, 0)),
            ),
            compiler_params=pltpu.CompilerParams(
                dimension_semantics=("parallel",),
                vmem_limit_bytes=32 * 1024 * 1024),
            cost_estimate=cost,
        )(*inputs)

        return out.reshape(*orig_shape, G)


def _reference(distances, centers, variance, normalize_output, distance_mask=None):
    diff = distances[..., None] - centers                 # (E,B,N,G)
    g = jnp.exp(-(0.5 / variance) * diff ** 2)
    if normalize_output:
        g = g / jnp.sum(g, axis=-1, keepdims=True)
    if distance_mask is not None:
        g = g * distance_mask[..., None]
    return g


if __name__ == "__main__":
    key = jax.random.PRNGKey(0)
    k1, k2 = jax.random.split(key)

    # distances: [n_examples=2, n_beads=8, n_neighbors=8], units ~ Angstrom
    distances = jax.random.uniform(k1, (2, 8, 8), dtype=jnp.float32,
                                   minval=0.0, maxval=5.0)
    distance_mask = (jax.random.uniform(k2, (2, 8, 8)) > 0.2).astype(jnp.float32)

    # masked + normalized path
    rbf = GaussianRBF(low_cutoff=0.0, high_cutoff=5.0, n_gaussians=50,
                      variance=1.0, normalize_output=True)
    out = jax.block_until_ready(rbf(distances, distance_mask))
    ref = _reference(distances, rbf.centers, rbf.variance,
                     rbf.normalize_output, distance_mask)
    assert out.shape == (2, 8, 8, 50), out.shape
    assert jnp.allclose(out, ref, atol=1e-5, rtol=1e-5), \
        float(jnp.max(jnp.abs(out - ref)))

    # unmasked, unnormalized path
    rbf2 = GaussianRBF(normalize_output=False)
    out2 = jax.block_until_ready(rbf2(distances))
    ref2 = _reference(distances, rbf2.centers, rbf2.variance, False)
    assert out2.shape == (2, 8, 8, 50), out2.shape
    assert jnp.allclose(out2, ref2, atol=1e-5, rtol=1e-5), \
        float(jnp.max(jnp.abs(out2 - ref2)))

    print("KERNEL_OK")
</pallas_src>

<mosaic_0001>
module attributes {stable_mosaic.version = 11 : i64} {
  func.func @_rbf_kernel(%arg0: i32, %arg1: memref<128x1xf32, #tpu.memory_space<vmem>>, %arg2: memref<128x1xf32, #tpu.memory_space<vmem>>, %arg3: memref<128x50xf32, #tpu.memory_space<vmem>>) attributes {dimension_semantics = [#tpu.dimension_semantics<parallel>], iteration_bounds = array<i64: 1>, scalar_prefetch = 0 : i64, scratch_operands = 0 : i64, tpu.core_type = #tpu.core_type<tc>, window_params = [{transform_indices = @transform_0, window_bounds = array<i64: 128, 1>}, {transform_indices = @transform_1, window_bounds = array<i64: 128, 1>}, {transform_indices = @transform_2, window_bounds = array<i64: 128, 50>}]} {
    %c0 = arith.constant 0 : index
    %c0_0 = arith.constant 0 : index
    %0 = vector.load %arg1[%c0, %c0_0] : memref<128x1xf32, #tpu.memory_space<vmem>>, vector<128x1xf32>
    %1 = tpu.iota {dimensions = array<i32: 1>} : vector<1x50xi32>
    %2 = arith.sitofp %1 : vector<1x50xi32> to vector<1x50xf32>
    %cst = arith.constant 0.10204082 : f32
    %3 = vector.broadcast %cst : f32 to vector<1x50xf32>
    %4 = arith.mulf %3, %2 : vector<1x50xf32>
    %cst_1 = arith.constant 0.000000e+00 : f32
    %5 = vector.broadcast %cst_1 : f32 to vector<1x50xf32>
    %6 = arith.addf %5, %4 : vector<1x50xf32>
    %7 = vector.broadcast %0 : vector<128x1xf32> to vector<128x50xf32>
    %8 = vector.broadcast %6 : vector<1x50xf32> to vector<128x50xf32>
    %9 = arith.subf %7, %8 : vector<128x50xf32>
    %10 = arith.mulf %9, %9 : vector<128x50xf32>
    %cst_2 = arith.constant -5.000000e-01 : f32
    %11 = vector.broadcast %cst_2 : f32 to vector<128x50xf32>
    %12 = arith.mulf %11, %10 : vector<128x50xf32>
    %13 = math.exp %12 : vector<128x50xf32>
    %cst_3 = arith.constant dense<0.000000e+00> : vector<128xf32>
    %14 = vector.multi_reduction <add>, %13, %cst_3 [1] : vector<128x50xf32> to vector<128xf32>
    %15 = vector.shape_cast %14 : vector<128xf32> to vector<128x1xf32>
    %16 = tpu.reciprocal %15 : vector<128x1xf32> -> vector<128x1xf32>
    %c0_4 = arith.constant 0 : index
    %c0_5 = arith.constant 0 : index
    %17 = vector.load %arg2[%c0_4, %c0_5] : memref<128x1xf32, #tpu.memory_space<vmem>>, vector<128x1xf32>
    %18 = arith.mulf %16, %17 : vector<128x1xf32>
    %19 = vector.broadcast %18 : vector<128x1xf32> to vector<128x50xf32>
    %20 = arith.mulf %13, %19 : vector<128x50xf32>
    %c0_6 = arith.constant 0 : index
    %c0_7 = arith.constant 0 : index
    %21 = vector.load %arg3[%c0_6, %c0_7] : memref<128x50xf32, #tpu.memory_space<vmem>>, vector<128x50xf32>
    tpu.vector_store %arg3[%c0_6, %c0_7], %20 {strides = array<i32>} : memref<128x50xf32, #tpu.memory_space<vmem>>, vector<128x50xf32>,
    return
  }
  func.func @transform_0(%arg0: i32) -> (i32, i32) {
    %c0_i32 = arith.constant 0 : i32
    %c0_i32_0 = arith.constant 0 : i32
    return %arg0, %c0_i32 : i32, i32
  }
  func.func @transform_1(%arg0: i32) -> (i32, i32) {
    %c0_i32 = arith.constant 0 : i32
    %c0_i32_0 = arith.constant 0 : i32
    return %arg0, %c0_i32 : i32, i32
  }
  func.func @transform_2(%arg0: i32) -> (i32, i32) {
    %c0_i32 = arith.constant 0 : i32
    %c0_i32_0 = arith.constant 0 : i32
    return %arg0, %c0_i32 : i32, i32
  }
}

</mosaic_0001>

<bundles_post_ra>
// kernel: tpu_custom_call.1
= control target key start
LH: loop header
LB: loop body
LE: loop exit
PB: predicated region body
PF: predicated region fallthrough
CT: control target
= control target key end

     0   :  { %v681_v0 = vmov 0   ;;  %v27_v17 = vlaneseq  ;;  %vm192_vm0 = vcmask 408576   ;;  %s1235_s0 = inlined_call_operand.vmem [shape: f32[128,1], index: 0, kind: input, shape index: {}]   ;;  %s1236_s1 = inlined_call_operand.vmem [shape: f32[128,1], index: 1, kind: input, shape index: {}]   ;;  %s1237_s2 = inlined_call_operand.vmem [shape: f32[128,50], index: 2, kind: output, shape index: {}]  }
   0x1   :  { %615 = vset.pattern.permute.xlu1 %v681_v0  ;;  %614 = vset.pattern.permute.xlu0 %v681_v0  ;;  %v13_v1 = vld [vmem:[%s1235_s0 + $0x10] sm:$0xff]  ;;  %v11_v2 = vld [vmem:[%s1235_s0] sm:$0xff]  ;;  %v14_v4 = vld [vmem:[%s1235_s0 + $0x18] sm:$0xff] }
   0x2   :  { %44 = vperm.xlu1 %615, %v13_v1   ;;  %34 = vperm.xlu0 %614, %v11_v2   ;;  %v15_v3 = vld [vmem:[%s1235_s0 + $0x20] sm:$0xff]  ;;  %v12_v5 = vld [vmem:[%s1235_s0 + $0x8] sm:$0xff]  ;;  %v18_v7 = vld [vmem:[%s1235_s0 + $0x38] sm:$0xff]  ;;  %v28_v18 = vand.u32 127, %v27_v17 }
   0x3   :  { %616 = vset.pattern.permute.xlu2 %v681_v0  ;;  %v16_v6 = vld [vmem:[%s1235_s0 + $0x28] sm:$0xff]  ;;  %v17_v8 = vld [vmem:[%s1235_s0 + $0x30] sm:$0xff]  ;;  %v19_v9 = vld [vmem:[%s1235_s0 + $0x40] sm:$0xff] }
   0x4   :  { %54 = vperm.xlu2 %616, %v15_v3   ;;  %v21_v10 = vld [vmem:[%s1235_s0 + $0x50] sm:$0xff]  ;;  %v20_v11 = vld [vmem:[%s1235_s0 + $0x48] sm:$0xff]  ;;  %v22_v12 = vld [vmem:[%s1235_s0 + $0x58] sm:$0xff]  ;;  %v29_v19 = vcvt.s32.f32 %v28_v18 }
   0x5   :  { %v24_v13 = vld [vmem:[%s1235_s0 + $0x68] sm:$0xff]  ;;  %v23_v14 = vld [vmem:[%s1235_s0 + $0x60] sm:$0xff]  ;;  %v25_v15 = vld [vmem:[%s1235_s0 + $0x70] sm:$0xff] }
   0x6   :  { %v26_v16 = vld [vmem:[%s1235_s0 + $0x78] sm:$0xff]  ;;  %v745_v20 = vmul.f32 0.10204082, %v29_v19 }
   0xa   :  { %49 = vperm.xlu1 %615, %v14_v4   ;;  %39 = vperm.xlu0 %614, %v12_v5  }
   0xc   :  { %59 = vperm.xlu2 %616, %v16_v6  }
  0x12   :  { %69 = vperm.xlu1 %615, %v18_v7   ;;  %64 = vperm.xlu0 %614, %v17_v8  }
  0x14   :  { %74 = vperm.xlu2 %616, %v19_v9  }
  0x1a   :  { %84 = vperm.xlu1 %615, %v21_v10   ;;  %79 = vperm.xlu0 %614, %v20_v11  }
  0x1c   :  { %89 = vperm.xlu2 %616, %v22_v12  }
  0x22   :  { %99 = vperm.xlu1 %615, %v24_v13   ;;  %94 = vperm.xlu0 %614, %v23_v14  }
  0x24   :  { %104 = vperm.xlu2 %616, %v25_v15  }
  0x2a   :  { %109 = vperm.xlu0 %614, %v26_v16  }
  0x5e   :  { %v55_v21 = vpop.permute.xlu2 %54 }
  0x5f   :  { %v116_v22 = vsub.f32 %v55_v21, %v745_v20 }
  0x61   :  { %v132_v27 = vmul.f32 %v116_v22, %v116_v22 }
  0x63   :  { %v148_v32 = vmul.f32 -0.5, %v132_v27 }
  0x65   :  { %v168_v40 = vmul.f32 1.442695, %v148_v32 }
  0x66   :  { %v60_v33 = vpop.permute.xlu2 %59 }
  0x67   :  { %v117_v44 = vsub.f32 %v60_v33, %v745_v20 }
  0x69   :  { %v133_v56 = vmul.f32 %v117_v44, %v117_v44 }
  0x6b   :  { %v149_v63 = vmul.f32 -0.5, %v133_v56 }
  0x6d   :  { %v170_v10 = vmul.f32 1.442695, %v149_v63 }
  0x6e   :  { %v75_v52 = vpop.permute.xlu2 %74 }
  0x6f   :  { %v120_v4 = vsub.f32 %v75_v52, %v745_v20 }
  0x71   :  { %v136_v14 = vmul.f32 %v120_v4, %v120_v4 }
  0x74   :  { %v45_v23 = vpop.permute.xlu1 %44  ;;  %v35_v24 = vpop.permute.xlu0 %34 }
  0x75   :  { %v114_v25 = vsub.f32 %v45_v23, %v745_v20  ;;  %v112_v26 = vsub.f32 %v35_v24, %v745_v20  ;;  %v152_v23 = vmul.f32 -0.5, %v136_v14 }
  0x76   :  { %v90_v11 = vpop.permute.xlu2 %89 }
  0x77   :  { %v130_v28 = vmul.f32 %v114_v25, %v114_v25  ;;  %v128_v29 = vmul.f32 %v112_v26, %v112_v26  ;;  %v123_v24 = vsub.f32 %v90_v11, %v745_v20 }
  0x79   :  { %v146_v30 = vmul.f32 -0.5, %v130_v28  ;;  %v144_v31 = vmul.f32 -0.5, %v128_v29 }
  0x7b   :  { %v164_v34 = vmul.f32 1.442695, %v146_v30  ;;  %v160_v35 = vmul.f32 1.442695, %v144_v31 }
  0x7c   :  { %v50_v36 = vpop.permute.xlu1 %49  ;;  %v40_v37 = vpop.permute.xlu0 %39 }
  0x7d   :  { %617 = vpow2.f32 %v164_v34  ;;  %v115_v38 = vsub.f32 %v50_v36, %v745_v20  ;;  %v113_v39 = vsub.f32 %v40_v37, %v745_v20  ;;  %v139_v36 = vmul.f32 %v123_v24, %v123_v24 }
  0x7e   :  { %619 = vpow2.f32 %v160_v35  ;;  %v176_v35 = vmul.f32 1.442695, %v152_v23  ;;  %v105_v37 = vpop.permute.xlu2 %104 }
  0x7f   :  { %v131_v41 = vmul.f32 %v115_v38, %v115_v38  ;;  %v129_v42 = vmul.f32 %v113_v39, %v113_v39  ;;  %621 = vpow2.f32 %v168_v40 }
  0x81   :  { %v145_v43 = vmul.f32 -0.5, %v129_v42  ;;  %v147_v46 = vmul.f32 -0.5, %v131_v41 }
  0x83   :  { %v753_v45 = vpop.eup %617  ;;  %v162_v47 = vmul.f32 1.442695, %v145_v43  ;;  %v166_v57 = vmul.f32 1.442695, %v147_v46  ;;  %v155_v46 = vmul.f32 -0.5, %v139_v36 }
  0x84   :  { %v755_v48 = vpop.eup %619  ;;  %v70_v49 = vpop.permute.xlu1 %69  ;;  %v199_v51 = vsel %vm192_vm0, %v753_v45, 0.0 }
  0x85   :  { %v65_v50 = vpop.permute.xlu0 %64  ;;  %v119_v53 = vsub.f32 %v70_v49, %v745_v20  ;;  %200 = vadd.xlane.f32.xlu0 %v199_v51  ;;  %v193_v55 = vsel %vm192_vm0, %v755_v48, 0.0  ;;  %623 = vpow2.f32 %v162_v47  ;;  %v763_v60 = vpop.eup %621  ;;  %v126_v47 = vsub.f32 %v105_v37, %v745_v20 }
  0x86   :  { %v118_v54 = vsub.f32 %v65_v50, %v745_v20  ;;  %194 = vadd.xlane.f32.xlu1 %v193_v55  ;;  %625 = vpow2.f32 %v166_v57  ;;  %v205_v2 = vsel %vm192_vm0, %v763_v60, 0.0 }
  0x87   :  { %v135_v58 = vmul.f32 %v119_v53, %v119_v53  ;;  %v142_v55 = vmul.f32 %v126_v47, %v126_v47 }
  0x88   :  { %v134_v59 = vmul.f32 %v118_v54, %v118_v54  ;;  %v182_v54 = vmul.f32 1.442695, %v155_v46 }
  0x89   :  { %v151_v61 = vmul.f32 -0.5, %v135_v58 }
  0x8a   :  { %v150_v62 = vmul.f32 -0.5, %v134_v59 }
  0x8b   :  { %v174_v0 = vmul.f32 1.442695, %v151_v61  ;;  %v767_v3 = vpop.eup %623 }
  0x8c   :  { %v172_v1 = vmul.f32 1.442695, %v150_v62  ;;  %v85_v5 = vpop.permute.xlu1 %84  ;;  %v196_v9 = vsel %vm192_vm0, %v767_v3, 0.0  ;;  %v774_v15 = vpop.eup %625 }
  0x8d   :  { %v80_v6 = vpop.permute.xlu0 %79  ;;  %627 = vpow2.f32 %v174_v0  ;;  %v122_v7 = vsub.f32 %v85_v5, %v745_v20  ;;  %197 = vadd.xlane.f32.xlu2 %v196_v9  ;;  %v202_v28 = vsel %vm192_vm0, %v774_v15, 0.0 }
  0x8e   :  { %v121_v8 = vsub.f32 %v80_v6, %v745_v20  ;;  %629 = vpow2.f32 %v172_v1  ;;  %206 = vadd.xlane.f32.xlu1 %v205_v2 }
  0x8f   :  { %v138_v12 = vmul.f32 %v122_v7, %v122_v7  ;;  %631 = vpow2.f32 %v170_v10 }
  0x90   :  { %v137_v13 = vmul.f32 %v121_v8, %v121_v8 }
  0x91   :  { %v154_v16 = vmul.f32 -0.5, %v138_v12 }
  0x92   :  { %v153_v17 = vmul.f32 -0.5, %v137_v13 }
  0x93   :  { %v776_v18 = vpop.eup %627  ;;  %v180_v19 = vmul.f32 1.442695, %v154_v16 }
  0x94   :  { %v178_v21 = vmul.f32 1.442695, %v153_v17  ;;  %v778_v22 = vpop.eup %629  ;;  %v100_v25 = vpop.permute.xlu1 %99  ;;  %v214_v27 = vsel %vm192_vm0, %v776_v18, 0.0 }
  0x95   :  { %v95_v26 = vpop.permute.xlu0 %94  ;;  %633 = vpow2.f32 %v180_v19  ;;  %v125_v29 = vsub.f32 %v100_v25, %v745_v20  ;;  %v211_v31 = vsel %vm192_vm0, %v778_v22, 0.0  ;;  %203 = vadd.xlane.f32.xlu2 %v202_v28  ;;  %v789_v34 = vpop.eup %631 }
  0x96   :  { %v124_v30 = vsub.f32 %v95_v26, %v745_v20  ;;  %635 = vpow2.f32 %v178_v21  ;;  %215 = vadd.xlane.f32.xlu1 %v214_v27  ;;  %212 = vadd.xlane.f32.xlu0 %v211_v31  ;;  %v208_v43 = vsel %vm192_vm0, %v789_v34, 0.0 }
  0x97   :  { %v141_v32 = vmul.f32 %v125_v29, %v125_v29  ;;  %637 = vpow2.f32 %v176_v35 }
  0x98   :  { %v140_v33 = vmul.f32 %v124_v30, %v124_v30 }
  0x99   :  { %v157_v38 = vmul.f32 -0.5, %v141_v32 }
  0x9a   :  { %v156_v39 = vmul.f32 -0.5, %v140_v33 }
  0x9b   :  { %v791_v40 = vpop.eup %633  ;;  %v186_v41 = vmul.f32 1.442695, %v157_v38 }
  0x9c   :  { %v184_v42 = vmul.f32 1.442695, %v156_v39  ;;  %v795_v44 = vpop.eup %635  ;;  %v223_v50 = vsel %vm192_vm0, %v791_v40, 0.0 }
  0x9d   :  { %v110_v49 = vpop.permute.xlu0 %109  ;;  %639 = vpow2.f32 %v186_v41  ;;  %v220_v52 = vsel %vm192_vm0, %v795_v44, 0.0  ;;  %209 = vadd.xlane.f32.xlu2 %v208_v43  ;;  %v803_v57 = vpop.eup %637 }
  0x9e   :  { %v127_v51 = vsub.f32 %v110_v49, %v745_v20  ;;  %641 = vpow2.f32 %v184_v42  ;;  %224 = vadd.xlane.f32.xlu1 %v223_v50  ;;  %221 = vadd.xlane.f32.xlu0 %v220_v52  ;;  %v158_v20 = vmul.f32 -0.5, %v142_v55  ;;  %v217_v63 = vsel %vm192_vm0, %v803_v57, 0.0  ;;  %v467_v55 = vld [vmem:[%s1236_s1 + $0x10] sm:$0xff] }
  0x9f   :  { %643 = vpow2.f32 %v182_v54 }
  0xa0   :  { %v143_v53 = vmul.f32 %v127_v51, %v127_v51  ;;  %v188_v1 = vmul.f32 1.442695, %v158_v20 }
  0xa2   :  { %v159_v56 = vmul.f32 -0.5, %v143_v53  ;;  %v465_v53 = vld [vmem:[%s1236_s1] sm:$0xff] }
  0xa3   :  { %v805_v58 = vpop.eup %639 }
  0xa4   :  { %v190_v59 = vmul.f32 1.442695, %v159_v56  ;;  %v807_v61 = vpop.eup %641  ;;  %v232_v62 = vsel %vm192_vm0, %v805_v58, 0.0 }
  0xa5   :  { %v229_v0 = vsel %vm192_vm0, %v807_v61, 0.0  ;;  %218 = vadd.xlane.f32.xlu2 %v217_v63  ;;  %v815_v2 = vpop.eup %643 }
  0xa6   :  { %645 = vpow2.f32 %v190_v59  ;;  %233 = vadd.xlane.f32.xlu1 %v232_v62  ;;  %230 = vadd.xlane.f32.xlu0 %v229_v0  ;;  %v226_v6 = vsel %vm192_vm0, %v815_v2, 0.0 }
  0xa7   :  { %647 = vpow2.f32 %v188_v1 }
  0xac   :  { %v817_v4 = vpop.eup %645 }
  0xad   :  { %v238_v5 = vsel %vm192_vm0, %v817_v4, 0.0  ;;  %227 = vadd.xlane.f32.xlu2 %v226_v6  ;;  %v823_v7 = vpop.eup %647 }
  0xae   :  { %239 = vadd.xlane.f32.xlu0 %v238_v5  ;;  %v235_v8 = vsel %vm192_vm0, %v823_v7, 0.0 }
  0xb5   :  { %236 = vadd.xlane.f32.xlu2 %v235_v8 }
  0xf8   :  { %v201_v9 = vpop.xlane.xlu0 %200 }
  0xf9   :  { %v195_v10 = vpop.xlane.xlu1 %194  ;;  %649 = vrcp.f32 %v201_v9  ;;  %vm274_vm1 = vweird.f32 %v201_v9  ;;  %v280_v24 = vand.u32 2147483648, %v201_v9  ;;  %v278_v28 = vand.u32 2147483647, %v201_v9 }
  0xfa   :  { %651 = vrcp.f32 %v195_v10  ;;  %v252_v26 = vand.u32 2147483648, %v195_v10  ;;  %v250_v27 = vand.u32 2147483647, %v195_v10  ;;  %vm246_vm5 = vweird.f32 %v195_v10 }
  0xfb   :  { %v281_v33 = vor.u32 1.1754944e-38, %v280_v24  ;;  %vm279_vm8 = vcmp.eq.f32.partialorder %v278_v28, 8.507059e+37 }
  0xfc   :  { %v253_v37 = vor.u32 1.1754944e-38, %v252_v26  ;;  %vm849_vm7 = vcmp.eq.f32.partialorder %v250_v27, 8.507059e+37 }
  0xff   :  { %v650_v11 = vpop.eup %649 }
 0x100   :  { %v652_v12 = vpop.eup %651  ;;  %v270_v13 = vmul.f32 %v650_v11, %v201_v9  ;;  %v827_v17 = vpop.xlane.xlu2 %197  ;;  %vm275_vm2 = vweird.f32 %v650_v11 }
 0x101   :  { %v242_v14 = vmul.f32 %v652_v12, %v195_v10  ;;  %v207_v16 = vpop.xlane.xlu1 %206  ;;  %vm247_vm3 = vweird.f32 %v652_v12  ;;  %vm830_vm4 = vmor %vm274_vm1, %vm275_vm2  ;;  %v266_v52 = vand.u32 2147483648, %v827_v17  ;;  %v264_v59 = vand.u32 2147483647, %v827_v17 }
 0x102   :  { %v271_v19 = vsub.f32 1.0, %v270_v13  ;;  %653 = vrcp.f32 %v207_v16  ;;  %vm845_vm6 = vmor %vm246_vm5, %vm247_vm3  ;;  %v308_v46 = vand.u32 2147483648, %v207_v16  ;;  %v306_v20 = vand.u32 2147483647, %v207_v16 }
 0x103   :  { %v243_v21 = vsub.f32 1.0, %v242_v14  ;;  %655 = vrcp.f32 %v827_v17  ;;  %vm302_vm9 = vweird.f32 %v207_v16  ;;  %vm260_vm11 = vweird.f32 %v827_v17 }
 0x104   :  { %v272_v23 = vmul.f32 %v650_v11, %v271_v19  ;;  %v309_v9 = vor.u32 1.1754944e-38, %v308_v46  ;;  %v267_v10 = vor.u32 1.1754944e-38, %v266_v52  ;;  %vm879_vm12 = vcmp.eq.f32.partialorder %v264_v59, 8.507059e+37 }
 0x105   :  { %v244_v25 = vmul.f32 %v652_v12, %v243_v21  ;;  %vm887_vm14 = vcmp.eq.f32.partialorder %v306_v20, 8.507059e+37 }
 0x106   :  { %v273_v29 = vadd.f32 %v650_v11, %v272_v23 }
 0x107   :  { %v245_v30 = vadd.f32 %v652_v12, %v244_v25 }
 0x108   :  { %v834_v32 = vpop.eup %653  ;;  %v277_v35 = vsel %vm830_vm4, %v650_v11, %v273_v29  ;;  %v843_v41 = vpop.xlane.xlu2 %203 }
 0x109   :  { %v838_v36 = vpop.eup %655  ;;  %v298_v38 = vmul.f32 %v834_v32, %v207_v16  ;;  %v841_v39 = vpop.xlane.xlu1 %215  ;;  %v249_v50 = vsel %vm845_vm6, %v652_v12, %v245_v30  ;;  %v282_v54 = vsel %vm279_vm8, %v281_v33, %v277_v35  ;;  %vm303_vm10 = vweird.f32 %v834_v32  ;;  %v469_v35 = vld [vmem:[%s1236_s1 + $0x20] sm:$0xff] }
 0x10a   :  { %v256_v47 = vmul.f32 %v838_v36, %v827_v17  ;;  %657 = vrcp.f32 %v841_v39  ;;  %v856_v49 = vpop.xlane.xlu0 %212  ;;  %v254_v63 = vsel %vm849_vm7, %v253_v37, %v249_v50  ;;  %v483_v5 = vmul.f32 %v467_v55, %v282_v54  ;;  %vm883_vm13 = vmor %vm302_vm9, %vm303_vm10 }
 0x10b   :  { %v299_v51 = vsub.f32 1.0, %v298_v38  ;;  %659 = vrcp.f32 %v843_v41  ;;  %v481_v1 = vmul.f32 %v465_v53, %v254_v63  ;;  %v350_v19 = vand.u32 2147483648, %v841_v39 }
 0x10c   :  { %v257_v56 = vsub.f32 1.0, %v256_v47  ;;  %661 = vrcp.f32 %v856_v49  ;;  %509 = vperm.xlu0 %614, %v483_v5   ;;  %v294_v21 = vand.u32 2147483648, %v843_v41  ;;  %v336_v23 = vand.u32 2147483648, %v856_v49 }
 0x10d   :  { %v300_v62 = vmul.f32 %v834_v32, %v299_v51  ;;  %499 = vperm.xlu1 %615, %v481_v1   ;;  %vm261_vm15 = vweird.f32 %v838_v36  ;;  %vm344_vm1 = vweird.f32 %v841_v39  ;;  %vm288_vm2 = vweird.f32 %v843_v41 }
 0x10e   :  { %v258_v0 = vmul.f32 %v838_v36, %v257_v56  ;;  %v292_v37 = vand.u32 2147483647, %v843_v41  ;;  %v351_v38 = vor.u32 1.1754944e-38, %v350_v19  ;;  %v295_v42 = vor.u32 1.1754944e-38, %v294_v21  ;;  %vm262_vm3 = vmor %vm260_vm11, %vm261_vm15 }
 0x10f   :  { %v301_v6 = vadd.f32 %v834_v32, %v300_v62  ;;  %v924_v46 = vor.u32 1.1754944e-38, %v336_v23  ;;  %v348_v55 = vand.u32 2147483647, %v841_v39 }
 0x110   :  { %v877_v8 = vpop.eup %657  ;;  %v900_v25 = vpop.xlane.xlu2 %209  ;;  %v259_v29 = vadd.f32 %v838_v36, %v258_v0  ;;  %vm943_vm4 = vcmp.eq.f32.partialorder %v292_v37, 8.507059e+37 }
 0x111   :  { %v891_v14 = vpop.eup %659  ;;  %v340_v16 = vmul.f32 %v877_v8, %v841_v39  ;;  %v898_v24 = vpop.xlane.xlu1 %224  ;;  %v305_v31 = vsel %vm883_vm13, %v834_v32, %v301_v6  ;;  %v466_v32 = vld [vmem:[%s1236_s1 + $0x8] sm:$0xff]  ;;  %v322_v59 = vand.u32 2147483648, %v900_v25  ;;  %vm345_vm5 = vweird.f32 %v877_v8  ;;  %v468_v39 = vld [vmem:[%s1236_s1 + $0x18] sm:$0xff] }
 0x112   :  { %v902_v26 = vpop.eup %661  ;;  %v284_v27 = vmul.f32 %v891_v14, %v843_v41  ;;  %663 = vrcp.f32 %v898_v24  ;;  %v907_v28 = vpop.xlane.xlu0 %221  ;;  %v263_v51 = vsel %vm262_vm3, %v838_v36, %v259_v29  ;;  %v310_v52 = vsel %vm887_vm14, %v309_v9, %v305_v31  ;;  %vm978_vm9 = vmor %vm344_vm1, %vm345_vm5 }
 0x113   :  { %v341_v30 = vsub.f32 1.0, %v340_v16  ;;  %665 = vrcp.f32 %v900_v25  ;;  %v326_v43 = vmul.f32 %v902_v26, %v856_v49  ;;  %v392_v53 = vand.u32 2147483648, %v898_v24 }
 0x114   :  { %v285_v33 = vsub.f32 1.0, %v284_v27  ;;  %667 = vrcp.f32 %v907_v28  ;;  %v268_v54 = vsel %vm879_vm12, %v267_v10, %v263_v51  ;;  %v485_v17 = vmul.f32 %v469_v35, %v310_v52  ;;  %v472_v35 = vld [vmem:[%s1236_s1 + $0x38] sm:$0xff] }
 0x115   :  { %v342_v47 = vmul.f32 %v877_v8, %v341_v30  ;;  %v482_v20 = vmul.f32 %v466_v32, %v268_v54  ;;  %v334_v36 = vand.u32 2147483647, %v856_v49  ;;  %v327_v0 = vsub.f32 1.0, %v326_v43 }
 0x116   :  { %v286_v50 = vmul.f32 %v891_v14, %v285_v33  ;;  %519 = vperm.xlu0 %614, %v485_v17   ;;  %vm289_vm6 = vweird.f32 %v891_v14  ;;  %vm386_vm7 = vweird.f32 %v898_v24  ;;  %v968_v19 = vor.u32 1.1754944e-38, %v392_v53 }
 0x117   :  { %504 = vperm.xlu2 %616, %v482_v20   ;;  %v343_v13 = vadd.f32 %v877_v8, %v342_v47  ;;  %vm316_vm8 = vweird.f32 %v900_v25  ;;  %v323_v23 = vor.u32 1.1754944e-38, %v322_v59  ;;  %v378_v27 = vand.u32 2147483648, %v907_v28  ;;  %vm290_vm10 = vmor %vm288_vm2, %vm289_vm6 }
 0x118   :  { %v940_v56 = vpop.eup %663  ;;  %v954_v6 = vpop.xlane.xlu2 %218  ;;  %v287_v9 = vadd.f32 %v891_v14, %v286_v50  ;;  %v328_v30 = vmul.f32 %v902_v26, %v327_v0  ;;  %vm349_vm11 = vcmp.eq.f32.partialorder %v348_v55, 8.507059e+37  ;;  %v320_v41 = vand.u32 2147483647, %v900_v25 }
 0x119   :  { %v948_v63 = vpop.eup %665  ;;  %v382_v1 = vmul.f32 %v940_v56, %v898_v24  ;;  %v952_v5 = vpop.xlane.xlu1 %233  ;;  %v347_v32 = vsel %vm978_vm9, %v877_v8, %v343_v13  ;;  %vm330_vm12 = vweird.f32 %v856_v49  ;;  %vm387_vm13 = vweird.f32 %v940_v56 }
 0x11a   :  { %v958_v10 = vpop.eup %667  ;;  %v312_v11 = vmul.f32 %v948_v63, %v900_v25  ;;  %669 = vrcp.f32 %v952_v5  ;;  %v963_v12 = vpop.xlane.xlu0 %230  ;;  %v291_v43 = vsel %vm290_vm10, %v891_v14, %v287_v9  ;;  %v434_v47 = vand.u32 2147483648, %v952_v5 }
 0x11b   :  { %v383_v16 = vsub.f32 1.0, %v382_v1  ;;  %671 = vrcp.f32 %v954_v6  ;;  %v368_v33 = vmul.f32 %v958_v10, %v907_v28  ;;  %v296_v50 = vsel %vm943_vm4, %v295_v42, %v291_v43  ;;  %vm388_vm4 = vmor %vm386_vm7, %vm387_vm13 }
 0x11c   :  { %v313_v21 = vsub.f32 1.0, %v312_v11  ;;  %673 = vrcp.f32 %v963_v12  ;;  %v352_v51 = vsel %vm349_vm11, %v351_v38, %v347_v32  ;;  %v484_v53 = vmul.f32 %v468_v39, %v296_v50  ;;  %v471_v50 = vld [vmem:[%s1236_s1 + $0x30] sm:$0xff] }
 0x11d   :  { %v384_v31 = vmul.f32 %v940_v56, %v383_v16  ;;  %v488_v14 = vmul.f32 %v472_v35, %v352_v51  ;;  %vm317_vm14 = vweird.f32 %v948_v63  ;;  %v369_v17 = vsub.f32 1.0, %v368_v33  ;;  %v470_v16 = vld [vmem:[%s1236_s1 + $0x28] sm:$0xff]  ;;  %v475_v35 = vld [vmem:[%s1236_s1 + $0x50] sm:$0xff] }
 0x11e   :  { %v314_v37 = vmul.f32 %v948_v63, %v313_v21  ;;  %v364_v59 = vand.u32 2147483648, %v954_v6  ;;  %v1021_v62 = vor.u32 1.1754944e-38, %v378_v27  ;;  %514 = vperm.xlu1 %615, %v484_v53   ;;  %v390_v9 = vand.u32 2147483647, %v898_v24  ;;  %vm318_vm1 = vmor %vm316_vm8, %vm317_vm14 }
 0x11f   :  { %v385_v38 = vadd.f32 %v940_v56, %v384_v31  ;;  %534 = vperm.xlu0 %614, %v488_v14   ;;  %v1029_v13 = vor.u32 1.1754944e-38, %v434_v47  ;;  %vm358_vm15 = vweird.f32 %v954_v6  ;;  %vm428_vm2 = vweird.f32 %v952_v5 }
 0x120   :  { %v1007_v52 = vpop.eup %669  ;;  %v315_v54 = vadd.f32 %v948_v63, %v314_v37  ;;  %v1016_v42 = vpop.xlane.xlu2 %227  ;;  %vm321_vm3 = vcmp.eq.f32.partialorder %v320_v41, 8.507059e+37  ;;  %v370_v25 = vmul.f32 %v958_v10, %v369_v17  ;;  %v365_v31 = vor.u32 1.1754944e-38, %v364_v59 }
 0x121   :  { %v1011_v8 = vpop.eup %671  ;;  %v424_v55 = vmul.f32 %v1007_v52, %v952_v5  ;;  %675 = vrcp.f32 %v1016_v42  ;;  %v389_v39 = vsel %vm388_vm4, %v940_v56, %v385_v38  ;;  %vm391_vm5 = vcmp.eq.f32.partialorder %v390_v9, 8.507059e+37 }
 0x122   :  { %v1019_v20 = vpop.eup %673  ;;  %v354_v0 = vmul.f32 %v1011_v8, %v954_v6  ;;  %v1026_v1 = vpop.xlane.xlu0 %239  ;;  %v319_v29 = vsel %vm318_vm1, %v948_v63, %v315_v54  ;;  %vm372_vm6 = vweird.f32 %v907_v28  ;;  %v406_v24 = vand.u32 2147483648, %v1016_v42 }
 0x123   :  { %v425_v11 = vsub.f32 1.0, %v424_v55  ;;  %677 = vrcp.f32 %v1026_v1  ;;  %v410_v27 = vmul.f32 %v1019_v20, %v963_v12  ;;  %v324_v33 = vsel %vm321_vm3, %v323_v23, %v319_v29 }
 0x124   :  { %v355_v21 = vsub.f32 1.0, %v354_v0  ;;  %v486_v43 = vmul.f32 %v470_v16, %v324_v33  ;;  %v394_v32 = vsel %vm391_vm5, %v968_v19, %v389_v39  ;;  %v329_v23 = vadd.f32 %v902_v26, %v328_v30 }
 0x125   :  { %v426_v37 = vmul.f32 %v1007_v52, %v425_v11  ;;  %vm331_vm7 = vweird.f32 %v902_v26  ;;  %v411_v41 = vsub.f32 1.0, %v410_v27  ;;  %v491_v47 = vmul.f32 %v475_v35, %v394_v32 }
 0x126   :  { %v356_v63 = vmul.f32 %v1011_v8, %v355_v21  ;;  %524 = vperm.xlu2 %616, %v486_v43   ;;  %vm332_vm8 = vmor %vm330_vm12, %vm331_vm7  ;;  %vm359_vm9 = vweird.f32 %v1011_v8  ;;  %vm335_vm10 = vcmp.eq.f32.partialorder %v334_v36, 8.507059e+37  ;;  %v362_v54 = vand.u32 2147483647, %v954_v6  ;;  %v473_v6 = vld [vmem:[%s1236_s1 + $0x40] sm:$0xff] }
 0x127   :  { %v1060_v56 = vpop.eup %675  ;;  %v333_v53 = vsel %vm332_vm8, %v902_v26, %v329_v23  ;;  %549 = vperm.xlu0 %614, %v491_v47   ;;  %vm1085_vm11 = vmor %vm358_vm15, %vm359_vm9  ;;  %v427_v49 = vadd.f32 %v1007_v52, %v426_v37  ;;  %vm414_vm12 = vweird.f32 %v963_v12  ;;  %vm400_vm13 = vweird.f32 %v1016_v42 }
 0x128   :  { %v357_v51 = vadd.f32 %v1011_v8, %v356_v63  ;;  %v396_v30 = vmul.f32 %v1060_v56, %v1016_v42  ;;  %v1076_v14 = vpop.xlane.xlu2 %236  ;;  %v338_v55 = vsel %vm335_vm10, %v924_v46, %v333_v53  ;;  %v412_v38 = vmul.f32 %v1019_v20, %v411_v41 }
 0x129   :  { %v1069_v19 = vpop.eup %677  ;;  %679 = vrcp.f32 %v1076_v14  ;;  %v487_v36 = vmul.f32 %v471_v50, %v338_v55  ;;  %vm363_vm14 = vcmp.eq.f32.partialorder %v362_v54, 8.507059e+37  ;;  %vm429_vm15 = vweird.f32 %v1007_v52 }
 0x12a   :  { %v452_v17 = vmul.f32 %v1069_v19, %v1026_v1  ;;  %v397_v26 = vsub.f32 1.0, %v396_v30  ;;  %v361_v46 = vsel %vm1085_vm11, %v1011_v8, %v357_v51  ;;  %v432_v0 = vand.u32 2147483647, %v952_v5  ;;  %vm430_vm1 = vmor %vm428_vm2, %vm429_vm15  ;;  %v478_v8 = vld [vmem:[%s1236_s1 + $0x68] sm:$0xff] }
 0x12b   :  { %v407_v11 = vor.u32 1.1754944e-38, %v406_v24  ;;  %529 = vperm.xlu1 %615, %v487_v36   ;;  %v366_v16 = vsel %vm363_vm14, %v365_v31, %v361_v46  ;;  %v371_v21 = vadd.f32 %v958_v10, %v370_v25  ;;  %v431_v33 = vsel %vm430_vm1, %v1007_v52, %v427_v49  ;;  %v474_v25 = vld [vmem:[%s1236_s1 + $0x48] sm:$0xff] }
 0x12c   :  { %v398_v9 = vmul.f32 %v1060_v56, %v397_v26  ;;  %v453_v27 = vsub.f32 1.0, %v452_v17  ;;  %v489_v29 = vmul.f32 %v473_v6, %v366_v16  ;;  %vm433_vm3 = vcmp.eq.f32.partialorder %v432_v0, 8.507059e+37  ;;  %v480_v16 = vld [vmem:[%s1236_s1 + $0x78] sm:$0xff] }
 0x12d   :  { %v436_v39 = vsel %vm433_vm3, %v1029_v13, %v431_v33  ;;  %vm373_vm4 = vweird.f32 %v958_v10  ;;  %v376_v31 = vand.u32 2147483647, %v907_v28  ;;  %vm401_vm5 = vweird.f32 %v1060_v56  ;;  %v476_v28 = vld [vmem:[%s1236_s1 + $0x58] sm:$0xff] }
 0x12e   :  { %v399_v5 = vadd.f32 %v1060_v56, %v398_v9  ;;  %539 = vperm.xlu2 %616, %v489_v29   ;;  %v494_v37 = vmul.f32 %v478_v8, %v436_v39  ;;  %vm374_vm2 = vmor %vm372_vm6, %vm373_vm4  ;;  %v404_v52 = vand.u32 2147483647, %v1016_v42  ;;  %v413_v13 = vadd.f32 %v1019_v20, %v412_v38 }
 0x12f   :  { %v680_v35 = vpop.eup %679  ;;  %v375_v43 = vsel %vm374_vm2, %v958_v10, %v371_v21  ;;  %vm377_vm7 = vcmp.eq.f32.partialorder %v376_v31, 8.507059e+37  ;;  %vm402_vm8 = vmor %vm400_vm13, %vm401_vm5  ;;  %vm415_vm6 = vweird.f32 %v1019_v20  ;;  %v420_v24 = vand.u32 2147483648, %v963_v12 }
 0x130   :  { %v438_v63 = vmul.f32 %v680_v35, %v1076_v14  ;;  %564 = vperm.xlu0 %614, %v494_v37   ;;  %v380_v32 = vsel %vm377_vm7, %v1021_v62, %v375_v43  ;;  %v403_v23 = vsel %vm402_vm8, %v1060_v56, %v399_v5  ;;  %vm405_vm9 = vcmp.eq.f32.partialorder %v404_v52, 8.507059e+37  ;;  %vm416_vm10 = vmor %vm414_vm12, %vm415_vm6 }
 0x131   :  { %v490_v10 = vmul.f32 %v474_v25, %v380_v32  ;;  %v408_v47 = vsel %vm405_vm9, %v407_v11, %v403_v23  ;;  %v418_v42 = vand.u32 2147483647, %v963_v12  ;;  %v454_v50 = vmul.f32 %v1069_v19, %v453_v27  ;;  %v477_v12 = vld [vmem:[%s1236_s1 + $0x60] sm:$0xff] }
 0x132   :  { %v439_v41 = vsub.f32 1.0, %v438_v63  ;;  %v448_v51 = vand.u32 2147483648, %v1076_v14  ;;  %v492_v30 = vmul.f32 %v476_v28, %v408_v47  ;;  %v417_v62 = vsel %vm416_vm10, %v1019_v20, %v413_v13  ;;  %v479_v20 = vld [vmem:[%s1236_s1 + $0x70] sm:$0xff] }
 0x133   :  { %544 = vperm.xlu1 %615, %v490_v10   ;;  %vm443_vm11 = vweird.f32 %v680_v35  ;;  %v446_v56 = vand.u32 2147483647, %v1076_v14  ;;  %v421_v54 = vor.u32 1.1754944e-38, %v420_v24  ;;  %vm442_vm13 = vweird.f32 %v1076_v14 }
 0x134   :  { %v440_v53 = vmul.f32 %v680_v35, %v439_v41  ;;  %vm419_vm14 = vcmp.eq.f32.partialorder %v418_v42, 8.507059e+37  ;;  %v449_v55 = vor.u32 1.1754944e-38, %v448_v51  ;;  %vm444_vm12 = vmor %vm442_vm13, %vm443_vm11  ;;  %v455_v26 = vadd.f32 %v1069_v19, %v454_v50 }
 0x135   :  { %v422_v59 = vsel %vm419_vm14, %v421_v54, %v417_v62  ;;  %vm447_vm15 = vcmp.eq.f32.partialorder %v446_v56, 8.507059e+37  ;;  %vm457_vm1 = vweird.f32 %v1069_v19  ;;  %v462_v14 = vand.u32 2147483648, %v1026_v1 }
 0x136   :  { %v441_v17 = vadd.f32 %v680_v35, %v440_v53  ;;  %554 = vperm.xlu2 %616, %v492_v30   ;;  %vm456_vm3 = vweird.f32 %v1026_v1  ;;  %v493_v46 = vmul.f32 %v477_v12, %v422_v59  ;;  %v460_v6 = vand.u32 2147483647, %v1026_v1 }
 0x137   :  { %vm458_vm4 = vmor %vm456_vm3, %vm457_vm1  ;;  %v463_v9 = vor.u32 1.1754944e-38, %v462_v14 }
 0x138   :  { %v445_v49 = vsel %vm444_vm12, %v680_v35, %v441_v17  ;;  %v459_v0 = vsel %vm458_vm4, %v1069_v19, %v455_v26  ;;  %vm461_vm2 = vcmp.eq.f32.partialorder %v460_v6, 8.507059e+37 }
 0x139   :  { %v450_v36 = vsel %vm447_vm15, %v449_v55, %v445_v49  ;;  %v464_v11 = vsel %vm461_vm2, %v463_v9, %v459_v0 }
 0x13a   :  { %v495_v38 = vmul.f32 %v479_v20, %v450_v36  ;;  %v496_v8 = vmul.f32 %v480_v16, %v464_v11 }
 0x13b   :  { %559 = vperm.xlu1 %615, %v493_v46  }
 0x13e   :  { %569 = vperm.xlu2 %616, %v495_v38  }
 0x143   :  { %574 = vperm.xlu1 %615, %v496_v8  }
 0x171   :  { %v505_v21 = vpop.permute.xlu2 %504 }
 0x172   :  { %v578_v27 = vmul.f32 %v767_v3, %v505_v21 }
 0x174   :  { %594 = vst.msk [vmem:[%s1237_s2 + $0x8] sm:$0xff] %vm192_vm0, %v578_v27 }
 0x17e   :  { %v510_v39 = vpop.permute.xlu0 %509 }
 0x17f   :  { %v500_v1 = vpop.permute.xlu1 %499  ;;  %v579_v31 = vmul.f32 %v753_v45, %v510_v39 }
 0x180   :  { %v525_v19 = vpop.permute.xlu2 %524  ;;  %v577_v29 = vmul.f32 %v755_v48, %v500_v1 }
 0x181   :  { %v582_v33 = vmul.f32 %v789_v34, %v525_v19  ;;  %595 = vst.msk [vmem:[%s1237_s2 + $0x10] sm:$0xff] %vm192_vm0, %v579_v31 }
 0x182   :  { %593 = vst.msk [vmem:[%s1237_s2] sm:$0xff] %vm192_vm0, %v577_v29 }
 0x183   :  { %598 = vst.msk [vmem:[%s1237_s2 + $0x28] sm:$0xff] %vm192_vm0, %v582_v33 }
 0x188   :  { %v540_v48 = vpop.permute.xlu2 %539  ;;  %v520_v34 = vpop.permute.xlu0 %519 }
 0x189   :  { %v585_v3 = vmul.f32 %v803_v57, %v540_v48  ;;  %v581_v45 = vmul.f32 %v763_v60, %v520_v34 }
 0x18b   :  { %601 = vst.msk [vmem:[%s1237_s2 + $0x40] sm:$0xff] %vm192_vm0, %v585_v3 }
 0x18c   :  { %597 = vst.msk [vmem:[%s1237_s2 + $0x20] sm:$0xff] %vm192_vm0, %v581_v45 }
 0x190   :  { %v555_v5 = vpop.permute.xlu2 %554  ;;  %v515_v37 = vpop.permute.xlu1 %514 }
 0x191   :  { %v588_v35 = vmul.f32 %v815_v2, %v555_v5  ;;  %v535_v25 = vpop.permute.xlu0 %534  ;;  %v580_v57 = vmul.f32 %v774_v15, %v515_v37 }
 0x192   :  { %v584_v60 = vmul.f32 %v776_v18, %v535_v25 }
 0x193   :  { %604 = vst.msk [vmem:[%s1237_s2 + $0x58] sm:$0xff] %vm192_vm0, %v588_v35 }
 0x194   :  { %596 = vst.msk [vmem:[%s1237_s2 + $0x18] sm:$0xff] %vm192_vm0, %v580_v57 }
 0x195   :  { %600 = vst.msk [vmem:[%s1237_s2 + $0x38] sm:$0xff] %vm192_vm0, %v584_v60 }
 0x198   :  { %v570_v2 = vpop.permute.xlu2 %569 }
 0x199   :  { %v591_v15 = vmul.f32 %v823_v7, %v570_v2  ;;  %v550_v52 = vpop.permute.xlu0 %549 }
 0x19a   :  { %v587_v18 = vmul.f32 %v791_v40, %v550_v52 }
 0x19b   :  { %607 = vst.msk [vmem:[%s1237_s2 + $0x70] sm:$0xff] %vm192_vm0, %v591_v15 }
 0x19c   :  { %603 = vst.msk [vmem:[%s1237_s2 + $0x50] sm:$0xff] %vm192_vm0, %v587_v18 }
 0x19d   :  { %v530_v13 = vpop.permute.xlu1 %529 }
 0x19e   :  { %v583_v63 = vmul.f32 %v778_v22, %v530_v13 }
 0x1a0   :  { %599 = vst.msk [vmem:[%s1237_s2 + $0x30] sm:$0xff] %vm192_vm0, %v583_v63 }
 0x1a2   :  { %v565_v7 = vpop.permute.xlu0 %564 }
 0x1a3   :  { %v590_v43 = vmul.f32 %v805_v58, %v565_v7 }
 0x1a5   :  { %v545_v28 = vpop.permute.xlu1 %544  ;;  %606 = vst.msk [vmem:[%s1237_s2 + $0x68] sm:$0xff] %vm192_vm0, %v590_v43 }
 0x1a6   :  { %v586_v40 = vmul.f32 %v795_v44, %v545_v28 }
 0x1a8   :  { %602 = vst.msk [vmem:[%s1237_s2 + $0x48] sm:$0xff] %vm192_vm0, %v586_v40 }
 0x1ad   :  { %v560_v22 = vpop.permute.xlu1 %559 }
 0x1ae   :  { %v589_v24 = vmul.f32 %v807_v61, %v560_v22 }
 0x1b0   :  { %605 = vst.msk [vmem:[%s1237_s2 + $0x60] sm:$0xff] %vm192_vm0, %v589_v24 }
 0x1b5   :  { %v575_v58 = vpop.permute.xlu1 %574 }
 0x1b6   :  { %v592_v32 = vmul.f32 %v817_v4, %v575_v58 }
 0x1b8   :  { %608 = vst.msk [vmem:[%s1237_s2 + $0x78] sm:$0xff] %vm192_vm0, %v592_v32 }

</bundles_post_ra>
